<compile_context>
chip_gen: v5e
topology: v5e:2x2
jax: 0.10.0
libtpu: 0.0.40
codegen_flags: <defaults>
</compile_context>

<pallas_src>
import functools

import jax
import jax.numpy as jnp
from jax.experimental import pallas as pl
from jax.experimental.pallas import tpu as pltpu


def _round_up(x, m):
    return (x + m - 1) // m * m


def _pick_tile(dim, cap):
    """Pick a lane-aligned tile (multiple of 128, <= cap) minimizing padding."""
    cands = {128, 256, 512, cap, min(cap, _round_up(dim, 128))}
    cands = sorted((c for c in cands if 128 <= c <= cap), reverse=True)
    best, best_waste = None, None
    for c in cands:
        waste = _round_up(dim, c) - dim
        if best is None or waste < best_waste:
            best, best_waste = c, waste
    return best


def _linear_kernel(*refs, has_bias):
    # With bias: (x, wt, b, o, acc); without: (x, wt, o, acc).
    if has_bias:
        x_ref, wt_ref, b_ref, o_ref, acc_ref = refs
    else:
        x_ref, wt_ref, o_ref, acc_ref = refs
        b_ref = None
    k = pl.program_id(2)

    @pl.when(k == 0)
    def _():
        acc_ref[...] = jnp.zeros_like(acc_ref)

    acc_ref[...] += jnp.dot(
        x_ref[...], wt_ref[...], preferred_element_type=jnp.float32
    )

    @pl.when(k == pl.num_programs(2) - 1)
    def _():
        acc = acc_ref[...]
        if has_bias:
            acc = acc + b_ref[...].astype(jnp.float32)
        o_ref[...] = acc.astype(o_ref.dtype)


def prepack_linear_weight(weight, bias=None, *, dtype=jnp.bfloat16,
                          max_block_n=512, max_block_k=1024):
    """IPEX-style one-time prepack.

    weight: (out_features, in_features); bias: (out_features,) or None.
    Returns (wt, bias2d, meta) where wt is the (K_pad, N_pad) compute-dtype
    weight, bias2d is (1, N_pad) f32 or None, and meta carries static shapes
    and the tile sizes chosen to minimize padding waste.
    """
    w = jnp.asarray(weight)
    n, k = w.shape
    tn = _pick_tile(n, max_block_n)
    tk = _pick_tile(k, max_block_k)
    n_pad = _round_up(n, tn)
    k_pad = _round_up(k, tk)

    wt = w.T.astype(dtype)                       # (K, N)
    if (k_pad, n_pad) != (k, n):
        wt = jnp.pad(wt, ((0, k_pad - k), (0, n_pad - n)))

    b2d = None
    if bias is not None:
        b2d = jnp.asarray(bias).astype(jnp.float32).reshape(1, n)
        if n_pad != n:
            b2d = jnp.pad(b2d, ((0, 0), (0, n_pad - n)))

    meta = dict(out_features=int(n), in_features=int(k), tn=int(tn), tk=int(tk))
    return wt, b2d, meta


@functools.partial(
    jax.jit,
    static_argnames=("out_features", "in_features", "tn", "tk", "block_m"),
)
def _ipex_linear_impl(x, wt, b2d, *, out_features, in_features, tn, tk,
                      block_m=512):
    n, k_dim = out_features, in_features
    k_pad, n_pad = wt.shape
    assert x.shape[-1] == k_dim, (x.shape, wt.shape)

    lead = x.shape[:-1]
    m = 1
    for d in lead:
        m *= d

    out_dtype = x.dtype
    compute_dtype = wt.dtype
    x2d = x.reshape(m, k_dim).astype(compute_dtype)

    itemsize = jnp.dtype(compute_dtype).itemsize
    m_align = max(8, 32 // itemsize)             # sublane packing of the operand

    tm = min(block_m, _round_up(m, m_align))
    m_pad = _round_up(m, tm)

    # v7x megacore: make sure the 'parallel' (M, N) axes yield >= 2 blocks so
    # both TensorCores get work on small GEMMs.
    if (m_pad // tm) * (n_pad // tn) == 1:
        if tn % 256 == 0:                        # keep tn a multiple of 128
            tn //= 2
        else:
            tm_new = _round_up((m + 1) // 2, m_align)
            if tm_new < tm:
                tm = tm_new
                m_pad = _round_up(m, tm)

    # Only activations may need padding on the per-call path.
    if (m_pad, k_pad) != (m, k_dim):
        x2d = jnp.pad(x2d, ((0, m_pad - m), (0, k_pad - k_dim)))

    grid = (m_pad // tm, n_pad // tn, k_pad // tk)
    grid_m, grid_n, _ = grid
    has_bias = b2d is not None

    x_spec = pl.BlockSpec((tm, tk), lambda i, j, k: (i, k))
    w_spec = pl.BlockSpec((tk, tn), lambda i, j, k: (k, j))
    if has_bias:
        in_specs = [x_spec, w_spec, pl.BlockSpec((1, tn), lambda i, j, k: (0, j))]
        operands = (x2d, wt, b2d)
    else:
        in_specs = [x_spec, w_spec]
        operands = (x2d, wt)

    bytes_accessed = (
        m_pad * k_pad * itemsize * grid_n          # x re-read per N tile
        + k_pad * n_pad * itemsize * grid_m        # weight re-read per M tile
        + m_pad * n_pad * jnp.dtype(out_dtype).itemsize   # output write
        + (n_pad * 4 * grid_m * grid_n if has_bias else 0)  # bias reads
    )

    out2d = pl.pallas_call(
        functools.partial(_linear_kernel, has_bias=has_bias),
        out_shape=jax.ShapeDtypeStruct((m_pad, n_pad), out_dtype),
        grid_spec=pltpu.PrefetchScalarGridSpec(
            num_scalar_prefetch=0,
            grid=grid,
            in_specs=in_specs,
            out_specs=pl.BlockSpec((tm, tn), lambda i, j, k: (i, j)),
            scratch_shapes=[pltpu.VMEM((tm, tn), jnp.float32)],
        ),
        compiler_params=pltpu.CompilerParams(
            dimension_semantics=("parallel", "parallel", "arbitrary"),
        ),
        cost_estimate=pl.CostEstimate(
            flops=2 * m_pad * k_pad * n_pad,
            transcendentals=0,
            bytes_accessed=int(bytes_accessed),
        ),
    )(*operands)

    if (m_pad, n_pad) != (m, n):
        out2d = out2d[:m, :n]
    return out2d.reshape(*lead, n)


def ipex_linear(x, prepacked, *, block_m=512):
    """Equivalent of _IPEXLinear.forward.  `prepacked` comes from
    prepack_linear_weight (the analogue of the IPEX prepack ctx)."""
    wt, b2d, meta = prepacked
    return _ipex_linear_impl(
        x, wt, b2d,
        out_features=meta["out_features"], in_features=meta["in_features"],
        tn=meta["tn"], tk=meta["tk"], block_m=block_m,
    )


if __name__ == "__main__":
    key = jax.random.PRNGKey(0)
    kx, kw, kb = jax.random.split(key, 3)

    # Case 1: small shapes from the module (batch=2, seq=8, in=32, out=64),
    # f32 compute dtype -> bit-tight check against the f32 reference.
    batch, seq, in_features, out_features = 2, 8, 32, 64
    x = jax.random.normal(kx, (batch, seq, in_features), dtype=jnp.float32)
    weight = jax.random.normal(kw, (out_features, in_features), dtype=jnp.float32) * 0.1
    bias = jax.random.normal(kb, (out_features,), dtype=jnp.float32) * 0.1

    packed = prepack_linear_weight(weight, bias, dtype=jnp.float32)
    out = jax.block_until_ready(ipex_linear(x, packed))
    ref = x @ weight.T + bias
    assert out.shape == (batch, seq, out_features), out.shape
    assert jnp.allclose(out, ref, atol=1e-4, rtol=1e-4), float(jnp.abs(out - ref).max())

    # Case 1b: bias-free specialized kernel.
    packed_nb = prepack_linear_weight(weight, None, dtype=jnp.float32)
    out_nb = jax.block_until_ready(ipex_linear(x, packed_nb))
    ref_nb = x @ weight.T
    assert jnp.allclose(out_nb, ref_nb, atol=1e-4, rtol=1e-4), float(
        jnp.abs(out_nb - ref_nb).max())

    # Case 2: odd (unaligned) shapes, default bf16 compute dtype with f32
    # accumulation -> exercises tile selection (tn=tk=384), padding and the
    # parallel-grid split; looser tolerance for bf16 operands.
    k2x, k2w, k2b = jax.random.split(jax.random.PRNGKey(1), 3)
    b2, s2, inf2, outf2 = 3, 100, 384, 320
    x2 = jax.random.normal(k2x, (b2, s2, inf2), dtype=jnp.float32)
    w2 = jax.random.normal(k2w, (outf2, inf2), dtype=jnp.float32) * 0.05
    bias2 = jax.random.normal(k2b, (outf2,), dtype=jnp.float32) * 0.05
    packed2 = prepack_linear_weight(w2, bias2)   # bf16 prepack (default)
    out2 = jax.block_until_ready(ipex_linear(x2, packed2))
    ref2 = x2 @ w2.T + bias2
    assert out2.shape == (b2, s2, outf2), out2.shape
    assert jnp.allclose(out2, ref2, atol=3e-2, rtol=3e-2), float(
        jnp.abs(out2 - ref2).max())

    print("KERNEL_OK")
</pallas_src>

<mosaic_0001>
module attributes {stable_mosaic.version = 11 : i64} {
  func.func @_linear_kernel(%arg0: i32, %arg1: i32, %arg2: i32, %arg3: memref<8x128xf32, #tpu.memory_space<vmem>>, %arg4: memref<128x128xf32, #tpu.memory_space<vmem>>, %arg5: memref<1x128xf32, #tpu.memory_space<vmem>>, %arg6: memref<8x128xf32, #tpu.memory_space<vmem>>, %arg7: memref<8x128xf32, #tpu.memory_space<vmem>>) attributes {dimension_semantics = [#tpu.dimension_semantics<parallel>, #tpu.dimension_semantics<parallel>, #tpu.dimension_semantics<arbitrary>], iteration_bounds = array<i64: 2, 1, 1>, scalar_prefetch = 0 : i64, scratch_operands = 1 : i64, tpu.core_type = #tpu.core_type<tc>, window_params = [{transform_indices = @transform_0, window_bounds = array<i64: 8, 128>}, {transform_indices = @transform_1, window_bounds = array<i64: 128, 128>}, {transform_indices = @transform_2, window_bounds = array<i64: 1, 128>}, {transform_indices = @transform_3, window_bounds = array<i64: 8, 128>}]} {
    %c0_i32 = arith.constant 0 : i32
    %0 = arith.cmpi eq, %arg2, %c0_i32 : i32
    %1 = arith.extui %0 : i1 to i32
    %c0_i32_0 = arith.constant 0 : i32
    %2 = arith.cmpi ne, %1, %c0_i32_0 : i32
    scf.if %2 {
      %cst_10 = arith.constant 0.000000e+00 : f32
      %12 = vector.broadcast %cst_10 : f32 to vector<8x128xf32>
      %c0_11 = arith.constant 0 : index
      %c0_12 = arith.constant 0 : index
      %13 = vector.load %arg7[%c0_11, %c0_12] : memref<8x128xf32, #tpu.memory_space<vmem>>, vector<8x128xf32>
      tpu.vector_store %arg7[%c0_11, %c0_12], %12 {strides = array<i32>} : memref<8x128xf32, #tpu.memory_space<vmem>>, vector<8x128xf32>,
    } else {
    }
    %c0 = arith.constant 0 : index
    %c0_1 = arith.constant 0 : index
    %3 = vector.load %arg7[%c0, %c0_1] : memref<8x128xf32, #tpu.memory_space<vmem>>, vector<8x128xf32>
    %c0_2 = arith.constant 0 : index
    %c0_3 = arith.constant 0 : index
    %4 = vector.load %arg3[%c0_2, %c0_3] : memref<8x128xf32, #tpu.memory_space<vmem>>, vector<8x128xf32>
    %c0_4 = arith.constant 0 : index
    %c0_5 = arith.constant 0 : index
    %5 = vector.load %arg4[%c0_4, %c0_5] : memref<128x128xf32, #tpu.memory_space<vmem>>, vector<128x128xf32>
    %cst = arith.constant dense<0.000000e+00> : vector<8x128xf32>
    %6 = tpu.matmul %4, %5, %cst {dimension_numbers = #tpu.dot_dimension_numbers<[1], [0], [0], [1], [0, 0, 1, 1], [], []>} : vector<8x128xf32>, vector<128x128xf32>, vector<8x128xf32> -> vector<8x128xf32>
    %7 = arith.addf %3, %6 : vector<8x128xf32>
    %c0_6 = arith.constant 0 : index
    %c0_7 = arith.constant 0 : index
    %8 = vector.load %arg7[%c0_6, %c0_7] : memref<8x128xf32, #tpu.memory_space<vmem>>, vector<8x128xf32>
    tpu.vector_store %arg7[%c0_6, %c0_7], %7 {strides = array<i32>} : memref<8x128xf32, #tpu.memory_space<vmem>>, vector<8x128xf32>,
    %c0_i32_8 = arith.constant 0 : i32
    %9 = arith.cmpi eq, %arg2, %c0_i32_8 : i32
    %10 = arith.extui %9 : i1 to i32
    %c0_i32_9 = arith.constant 0 : i32
    %11 = arith.cmpi ne, %10, %c0_i32_9 : i32
    scf.if %11 {
      %c0_10 = arith.constant 0 : index
      %c0_11 = arith.constant 0 : index
      %12 = vector.load %arg7[%c0_10, %c0_11] : memref<8x128xf32, #tpu.memory_space<vmem>>, vector<8x128xf32>
      %c0_12 = arith.constant 0 : index
      %c0_13 = arith.constant 0 : index
      %13 = vector.load %arg5[%c0_12, %c0_13] : memref<1x128xf32, #tpu.memory_space<vmem>>, vector<1x128xf32>
      %14 = vector.broadcast %13 : vector<1x128xf32> to vector<8x128xf32>
      %15 = arith.addf %12, %14 : vector<8x128xf32>
      %c0_14 = arith.constant 0 : index
      %c0_15 = arith.constant 0 : index
      %16 = vector.load %arg6[%c0_14, %c0_15] : memref<8x128xf32, #tpu.memory_space<vmem>>, vector<8x128xf32>
      tpu.vector_store %arg6[%c0_14, %c0_15], %15 {strides = array<i32>} : memref<8x128xf32, #tpu.memory_space<vmem>>, vector<8x128xf32>,
    } else {
    }
    return
  }
  func.func @transform_0(%arg0: i32, %arg1: i32, %arg2: i32) -> (i32, i32) {
    %c0_i32 = arith.constant 0 : i32
    return %arg0, %arg2 : i32, i32
  }
  func.func @transform_1(%arg0: i32, %arg1: i32, %arg2: i32) -> (i32, i32) {
    %c0_i32 = arith.constant 0 : i32
    return %arg2, %arg1 : i32, i32
  }
  func.func @transform_2(%arg0: i32, %arg1: i32, %arg2: i32) -> (i32, i32) {
    %c0_i32 = arith.constant 0 : i32
    %c0_i32_0 = arith.constant 0 : i32
    return %c0_i32, %arg1 : i32, i32
  }
  func.func @transform_3(%arg0: i32, %arg1: i32, %arg2: i32) -> (i32, i32) {
    %c0_i32 = arith.constant 0 : i32
    return %arg0, %arg1 : i32, i32
  }
}

</mosaic_0001>

<bundles_post_ra>
// kernel: _ipex_linear_impl.1
= control target key start
LH: loop header
LB: loop body
LE: loop exit
PB: predicated region body
PF: predicated region fallthrough
CT: control target
= control target key end

     0   :  { %8 = vsyncpa [#allocation4], 0  ;;  %s539_s12 = smov 0   ;;  %s541_s13 = smov 0   ;;  %s583_s0 = inlined_call_operand.vmem [shape: f32[16,128], index: 0, kind: input, shape index: {}]   ;;  %s584_s1 = inlined_call_operand.hbm [shape: f32[128,128], index: 1, kind: input, shape index: {}]   ;;  %s585_s2 = inlined_call_operand.vmem [shape: f32[1,128], index: 2, kind: input, shape index: {}]   ;;  %s586_s3 = inlined_call_operand.vmem [shape: f32[16,128], index: 3, kind: output, shape index: {}]  }
   0x1   :  { %s543_s14 = smov 0  }
   0x2 LB: > { %s408_s15 = sadd.s32 4294967295, %s514_s14   ;;  %s33_s16 = sadd.s32 1, %s510_s13  ;;  %s514_s14 = sphi %s543_s14, %s14_s14   ;;  %s510_s13 = sphi %s541_s13, %s588_s13   ;;  %s506_s12 = sphi %s539_s12, %s587_s12  }
   0x3   : > { %p35_p0 = scmp.ge.s32.totalorder %s33_s16, 2  ;;  %p410_p1 = scmp.ge.s32.totalorder %s514_s14, 1 }
   0x4   : > { %p148_p2 = scmp.lt.s32.totalorder %s514_s14, 3  ;;  %p428_p4 = scmp.eq.s32.totalorder %s408_s15, 0 }
   0x5   : > { %s590_s16 = smov (%p35_p0, %s33_s16), 0  ;;  %s163_s19 = sshll.u32 %s584_s1, 4  ;;  %s164_s19 = int_to_ptr.hbm [resolvable:$true] %s163_s19 }
   0x6   : > { %p149_p3 = pnand %p410_p1, %p148_p2  ;;  %s516_s20 = smov [#allocation3]  }
   0x7   : > { %s165_s21 = sshll.u32 %s516_s20, 4  ;;  %s517_s22 = smov 128   ;;  %s166_s21 = int_to_ptr.vmem [resolvable:$true] %s165_s21 }
   0x8   : > { %p424_p5 = pneg %p149_p3  ;;  %s518_s23 = smov 8  }
   0x9   : > { %197 = sbr.rel (%p149_p3) target bundleno = 176 (0xb0), region = 32 }
   0xa   : > { %p425_p6 = pnand %p428_p4, %p424_p5 }
   0xc   : > { %427 = dma.hbm_to_vmem [thread:$0]  (!%p425_p6), %s164_s19, 2048, %s166_s21, [#allocation4], %s517_s22, %s517_s22, %s518_s23  }
   0xe   : > { %501 = dma.done.wait (%p428_p4), [#allocation4], 2048  }
   0xf   : > { %503 = vsyncadd (%p428_p4), [#allocation4], 4294965248  ;;  %v269_v0 = vld [vmem:[#allocation3 + $0x78] sm:$0xff]  ;;  %v268_v1 = vld [vmem:[#allocation3 + $0x70] sm:$0xff]  ;;  %p229_p7 = scmp.lt.s32.totalorder %s506_s12, 1 }
  0x10   : > { %270 = vmatpush.msra.mxu0 %v269_v0  ;;  %v267_v2 = vld [vmem:[#allocation3 + $0x68] sm:$0xff]  ;;  %v266_v3 = vld [vmem:[#allocation3 + $0x60] sm:$0xff]  ;;  %v265_v4 = vld [vmem:[#allocation3 + $0x58] sm:$0xff] }
  0x11   : > { %v264_v5 = vld [vmem:[#allocation3 + $0x50] sm:$0xff]  ;;  %v263_v6 = vld [vmem:[#allocation3 + $0x48] sm:$0xff]  ;;  %v262_v7 = vld [vmem:[#allocation3 + $0x40] sm:$0xff]  ;;  %s592_s12 = smov (!%p229_p7, %s506_s12), 1 }
  0x12   : > { %271 = vmatpush.msra.mxu0 %v268_v1  ;;  %v261_v8 = vld [vmem:[#allocation3 + $0x38] sm:$0xff]  ;;  %v260_v9 = vld [vmem:[#allocation3 + $0x30] sm:$0xff]  ;;  %v259_v10 = vld [vmem:[#allocation3 + $0x28] sm:$0xff]  ;;  %s416_s24 = sshll.u32 %s592_s12, 3 }
  0x13   : > { %v258_v11 = vld [vmem:[#allocation3 + $0x20] sm:$0xff]  ;;  %v257_v12 = vld [vmem:[#allocation3 + $0x18] sm:$0xff]  ;;  %v256_v13 = vld [vmem:[#allocation3 + $0x10] sm:$0xff]  ;;  %s235_s27 = scalar_lea.vmem %s583_s0, %s416_s24  ;;  %s246_s5 = scalar_lea.vmem %s586_s3, %s416_s24 }
  0x14   : > { %272 = vmatpush.msra.mxu0 %v267_v2  ;;  %v255_v14 = vld [vmem:[#allocation3 + $0x8] sm:$0xff]  ;;  %v254_v15 = vld [vmem:[#allocation3] sm:$0xff] }
  0x15   : > { %v253_v16 = vld [vmem:[%s235_s27] sm:$0xff] }
  0x16   : > { %273 = vmatpush.msra.mxu0 %v266_v3  ;;  %v457_v17 = vld [vmem:[%s585_s2] ss:$0 sm:$0xff] }
  0x18   : > { %274 = vmatpush.msra.mxu0 %v265_v4 }
  0x1a   : > { %275 = vmatpush.msra.mxu0 %v264_v5 }
  0x1c   : > { %276 = vmatpush.msra.mxu0 %v263_v6 }
  0x1e   : > { %277 = vmatpush.msra.mxu0 %v262_v7 }
  0x20   : > { %278 = vmatpush.msra.mxu0 %v261_v8 }
  0x22   : > { %279 = vmatpush.msra.mxu0 %v260_v9 }
  0x24   : > { %280 = vmatpush.msra.mxu0 %v259_v10 }
  0x26   : > { %281 = vmatpush.msra.mxu0 %v258_v11 }
  0x28   : > { %282 = vmatpush.msra.mxu0 %v257_v12 }
  0x2a   : > { %283 = vmatpush.msra.mxu0 %v256_v13 }
  0x2c   : > { %284 = vmatpush.msra.mxu0 %v255_v14 }
  0x2e   : > { %285 = vmatpush.msra.mxu0 %v254_v15 }
  0x2f   : > { %286 = vmatmul.f32.vlgmr.msra.gmra.mxu0 %v253_v16 }
  0xac   : > { %v287_v18 = vpop.f32.mrf.mxu0 }
  0xad   : > { %v300_v19 = vadd.f32 %v457_v17, %v287_v18 }
  0xaf   : > { %301 = vst [vmem:[%s246_s5] sm:$0xff] %v300_v19 }
  0xb0 PF: > { %s14_s14 = sadd.s32 1, %s514_s14   ;;  %s587_s12 = smov %s510_s13 }
  0xb1   : > { %p11_p8 = scmp.ge.s32.totalorder %s14_s14, 4   ;;  %s588_s13 = smov %s590_s16 }
  0xb3   :  { %13 = sbr.rel (!%p11_p8) target bundleno = 2 (0x2), region = 79 }
  0xb8   :  { %327 = vsyncpa [#allocation4], 1 }
  0xb9   :  { %329 = vsyncpa [#allocation4 + $0x1], 1 }

</bundles_post_ra>
